<compile_context>
chip_gen: v7x
topology: tpu7x:2x2x1
jax: 0.10.0
libtpu: 0.0.40
codegen_flags: <defaults>
</compile_context>

<pallas_src>
import functools

import jax
import jax.numpy as jnp
from jax.experimental import pallas as pl
from jax.experimental.pallas import tpu as pltpu

seq_len = 8
batch_size = 1
hidden_size = 4
input_size = 4
num_layers = 1  # only 1 layer used by the module

_LANE = 128
_SUBLANE = 8


def rnn_kernel(x_ref, wih_t_ref, whh_t_ref, bias_ref, out_ref, *, T, B):
    # x_ref:     (R_pad, I_pad)  flattened, zero-padded input rows (R = T*B)
    # wih_t_ref: (I_pad, H_pad)  W_ih^T  (pre-transposed + zero-padded)
    # whh_t_ref: (H_pad, H_pad)  W_hh^T  (pre-transposed + zero-padded)
    # bias_ref:  (1, H_pad)      b_ih + b_hh (pre-summed + zero-padded)
    # out_ref:   (R_pad, H_pad)
    R_pad, H_pad = out_ref.shape
    R = T * B

    # Time-independent input projection: one lane-dense MXU matmul. Kept as an
    # f32 value (a handful of vregs at these sizes) — never round-tripped
    # through VMEM inside the recurrence.
    pre = jnp.dot(x_ref[...], wih_t_ref[...],
                  preferred_element_type=jnp.float32) + bias_ref[...]

    whh_t = whh_t_ref[...]

    # Serial recurrence over time with static indices. Padded hidden lanes of
    # `pre` and the zero-padded rows/cols of whh_t keep h[:, H:] == 0 exactly.
    h = jnp.zeros((B, H_pad), jnp.float32)
    hs = []
    for t in range(T):
        pre_t = jax.lax.slice_in_dim(pre, t * B, (t + 1) * B, axis=0)
        h = jnp.tanh(pre_t + jnp.dot(h, whh_t,
                                     preferred_element_type=jnp.float32))
        hs.append(h)

    out = jnp.concatenate(hs, axis=0)                    # (R, H_pad)
    if R_pad > R:                                        # sublane padding rows
        out = jnp.concatenate(
            [out, jnp.zeros((R_pad - R, H_pad), jnp.float32)], axis=0)

    # Single unmasked, lane-dense slab store.
    out_ref[...] = out.astype(out_ref.dtype)


def rnn_forward(x, w_ih, w_hh, b_ih, b_hh):
    T, B, I = x.shape
    H = w_ih.shape[0]

    I_pad = pl.cdiv(I, _LANE) * _LANE
    H_pad = pl.cdiv(H, _LANE) * _LANE
    R = T * B
    R_pad = pl.cdiv(R, _SUBLANE) * _SUBLANE

    # One-time wrapper-side layout work: flatten x, zero-pad to (8,128)
    # alignment, pre-transpose weights, fold the two biases into one.
    x2d = x.reshape(R, I)
    x_pad = jnp.zeros((R_pad, I_pad), x.dtype).at[:R, :I].set(x2d)
    wih_t = jnp.zeros((I_pad, H_pad), w_ih.dtype).at[:I, :H].set(w_ih.T)
    whh_t = jnp.zeros((H_pad, H_pad), w_hh.dtype).at[:H, :H].set(w_hh.T)
    bias = jnp.zeros((1, H_pad), b_ih.dtype).at[0, :H].set(b_ih + b_hh)

    vmem = pl.BlockSpec(memory_space=pltpu.MemorySpace.VMEM)
    out_pad = pl.pallas_call(
        functools.partial(rnn_kernel, T=T, B=B),
        out_shape=jax.ShapeDtypeStruct((R_pad, H_pad), x.dtype),
        in_specs=[vmem, vmem, vmem, vmem],
        out_specs=vmem,
    )(x_pad, wih_t, whh_t, bias)

    # out.view(-1, hidden_size)
    return out_pad[:R, :H]


def rnn_reference(x, w_ih, w_hh, b_ih, b_hh):
    # Pure-JAX reference for correctness check.
    def step(h, x_t):
        h_new = jnp.tanh(x_t @ w_ih.T + b_ih + h @ w_hh.T + b_hh)
        return h_new, h_new

    h0 = jnp.zeros((x.shape[1], w_ih.shape[0]), x.dtype)
    _, ys = jax.lax.scan(step, h0, x)
    return ys.reshape(-1, w_ih.shape[0])


if __name__ == "__main__":
    key = jax.random.PRNGKey(0)
    k_x, k_wih, k_whh, k_bih, k_bhh = jax.random.split(key, 5)

    # Same init distribution as PyTorch: U(-1/sqrt(H), 1/sqrt(H)).
    bound = 1.0 / (hidden_size ** 0.5)
    w_ih = jax.random.uniform(k_wih, (hidden_size, input_size), jnp.float32, -bound, bound)
    w_hh = jax.random.uniform(k_whh, (hidden_size, hidden_size), jnp.float32, -bound, bound)
    b_ih = jax.random.uniform(k_bih, (hidden_size,), jnp.float32, -bound, bound)
    b_hh = jax.random.uniform(k_bhh, (hidden_size,), jnp.float32, -bound, bound)

    x = jax.random.normal(k_x, (seq_len, batch_size, input_size), jnp.float32)

    out = rnn_forward(x, w_ih, w_hh, b_ih, b_hh)
    out = jax.block_until_ready(out)

    ref = rnn_reference(x, w_ih, w_hh, b_ih, b_hh)
    assert out.shape == (seq_len * batch_size, hidden_size)
    assert jnp.allclose(out, ref, atol=1e-5, rtol=1e-5)

    print("KERNEL_OK")
</pallas_src>

<mosaic_0001>
module attributes {stable_mosaic.version = 11 : i64} {
  func.func @rnn_kernel(%arg0: memref<8x128xf32, #tpu.memory_space<vmem>>, %arg1: memref<128x128xf32, #tpu.memory_space<vmem>>, %arg2: memref<128x128xf32, #tpu.memory_space<vmem>>, %arg3: memref<1x128xf32, #tpu.memory_space<vmem>>, %arg4: memref<8x128xf32, #tpu.memory_space<vmem>>) attributes {dimension_semantics = [], scalar_prefetch = 0 : i64, scratch_operands = 0 : i64, tpu.core_type = #tpu.core_type<tc>} {
    %c0 = arith.constant 0 : index
    %c0_0 = arith.constant 0 : index
    %0 = vector.load %arg0[%c0, %c0_0] : memref<8x128xf32, #tpu.memory_space<vmem>>, vector<8x128xf32>
    %c0_1 = arith.constant 0 : index
    %c0_2 = arith.constant 0 : index
    %1 = vector.load %arg1[%c0_1, %c0_2] : memref<128x128xf32, #tpu.memory_space<vmem>>, vector<128x128xf32>
    %cst = arith.constant dense<0.000000e+00> : vector<8x128xf32>
    %2 = tpu.matmul %0, %1, %cst {dimension_numbers = #tpu.dot_dimension_numbers<[1], [0], [0], [1], [0, 0, 1, 1], [], []>} : vector<8x128xf32>, vector<128x128xf32>, vector<8x128xf32> -> vector<8x128xf32>
    %c0_3 = arith.constant 0 : index
    %c0_4 = arith.constant 0 : index
    %3 = vector.load %arg3[%c0_3, %c0_4] : memref<1x128xf32, #tpu.memory_space<vmem>>, vector<1x128xf32>
    %4 = vector.broadcast %3 : vector<1x128xf32> to vector<8x128xf32>
    %5 = arith.addf %2, %4 : vector<8x128xf32>
    %c0_5 = arith.constant 0 : index
    %c0_6 = arith.constant 0 : index
    %6 = vector.load %arg2[%c0_5, %c0_6] : memref<128x128xf32, #tpu.memory_space<vmem>>, vector<128x128xf32>
    %cst_7 = arith.constant 0.000000e+00 : f32
    %7 = vector.broadcast %cst_7 : f32 to vector<1x128xf32>
    %8 = vector.extract_strided_slice %5 {offsets = [0, 0], sizes = [1, 128], strides = [1, 1]} : vector<8x128xf32> to vector<1x128xf32>
    %cst_8 = arith.constant dense<0.000000e+00> : vector<1x128xf32>
    %9 = tpu.matmul %7, %6, %cst_8 {dimension_numbers = #tpu.dot_dimension_numbers<[1], [0], [0], [1], [0, 0, 1, 1], [], []>} : vector<1x128xf32>, vector<128x128xf32>, vector<1x128xf32> -> vector<1x128xf32>
    %10 = arith.addf %8, %9 : vector<1x128xf32>
    %11 = math.tanh %10 : vector<1x128xf32>
    %12 = vector.extract_strided_slice %5 {offsets = [1, 0], sizes = [1, 128], strides = [1, 1]} : vector<8x128xf32> to vector<1x128xf32>
    %cst_9 = arith.constant dense<0.000000e+00> : vector<1x128xf32>
    %13 = tpu.matmul %11, %6, %cst_9 {dimension_numbers = #tpu.dot_dimension_numbers<[1], [0], [0], [1], [0, 0, 1, 1], [], []>} : vector<1x128xf32>, vector<128x128xf32>, vector<1x128xf32> -> vector<1x128xf32>
    %14 = arith.addf %12, %13 : vector<1x128xf32>
    %15 = math.tanh %14 : vector<1x128xf32>
    %16 = vector.extract_strided_slice %5 {offsets = [2, 0], sizes = [1, 128], strides = [1, 1]} : vector<8x128xf32> to vector<1x128xf32>
    %cst_10 = arith.constant dense<0.000000e+00> : vector<1x128xf32>
    %17 = tpu.matmul %15, %6, %cst_10 {dimension_numbers = #tpu.dot_dimension_numbers<[1], [0], [0], [1], [0, 0, 1, 1], [], []>} : vector<1x128xf32>, vector<128x128xf32>, vector<1x128xf32> -> vector<1x128xf32>
    %18 = arith.addf %16, %17 : vector<1x128xf32>
    %19 = math.tanh %18 : vector<1x128xf32>
    %20 = vector.extract_strided_slice %5 {offsets = [3, 0], sizes = [1, 128], strides = [1, 1]} : vector<8x128xf32> to vector<1x128xf32>
    %cst_11 = arith.constant dense<0.000000e+00> : vector<1x128xf32>
    %21 = tpu.matmul %19, %6, %cst_11 {dimension_numbers = #tpu.dot_dimension_numbers<[1], [0], [0], [1], [0, 0, 1, 1], [], []>} : vector<1x128xf32>, vector<128x128xf32>, vector<1x128xf32> -> vector<1x128xf32>
    %22 = arith.addf %20, %21 : vector<1x128xf32>
    %23 = math.tanh %22 : vector<1x128xf32>
    %24 = vector.extract_strided_slice %5 {offsets = [4, 0], sizes = [1, 128], strides = [1, 1]} : vector<8x128xf32> to vector<1x128xf32>
    %cst_12 = arith.constant dense<0.000000e+00> : vector<1x128xf32>
    %25 = tpu.matmul %23, %6, %cst_12 {dimension_numbers = #tpu.dot_dimension_numbers<[1], [0], [0], [1], [0, 0, 1, 1], [], []>} : vector<1x128xf32>, vector<128x128xf32>, vector<1x128xf32> -> vector<1x128xf32>
    %26 = arith.addf %24, %25 : vector<1x128xf32>
    %27 = math.tanh %26 : vector<1x128xf32>
    %28 = vector.extract_strided_slice %5 {offsets = [5, 0], sizes = [1, 128], strides = [1, 1]} : vector<8x128xf32> to vector<1x128xf32>
    %cst_13 = arith.constant dense<0.000000e+00> : vector<1x128xf32>
    %29 = tpu.matmul %27, %6, %cst_13 {dimension_numbers = #tpu.dot_dimension_numbers<[1], [0], [0], [1], [0, 0, 1, 1], [], []>} : vector<1x128xf32>, vector<128x128xf32>, vector<1x128xf32> -> vector<1x128xf32>
    %30 = arith.addf %28, %29 : vector<1x128xf32>
    %31 = math.tanh %30 : vector<1x128xf32>
    %32 = vector.extract_strided_slice %5 {offsets = [6, 0], sizes = [1, 128], strides = [1, 1]} : vector<8x128xf32> to vector<1x128xf32>
    %cst_14 = arith.constant dense<0.000000e+00> : vector<1x128xf32>
    %33 = tpu.matmul %31, %6, %cst_14 {dimension_numbers = #tpu.dot_dimension_numbers<[1], [0], [0], [1], [0, 0, 1, 1], [], []>} : vector<1x128xf32>, vector<128x128xf32>, vector<1x128xf32> -> vector<1x128xf32>
    %34 = arith.addf %32, %33 : vector<1x128xf32>
    %35 = math.tanh %34 : vector<1x128xf32>
    %36 = vector.extract_strided_slice %5 {offsets = [7, 0], sizes = [1, 128], strides = [1, 1]} : vector<8x128xf32> to vector<1x128xf32>
    %cst_15 = arith.constant dense<0.000000e+00> : vector<1x128xf32>
    %37 = tpu.matmul %35, %6, %cst_15 {dimension_numbers = #tpu.dot_dimension_numbers<[1], [0], [0], [1], [0, 0, 1, 1], [], []>} : vector<1x128xf32>, vector<128x128xf32>, vector<1x128xf32> -> vector<1x128xf32>
    %38 = arith.addf %36, %37 : vector<1x128xf32>
    %39 = math.tanh %38 : vector<1x128xf32>
    %40 = tpu.concatenate %11, %15, %19, %23, %27, %31, %35, %39 in 0 : vector<1x128xf32>, vector<1x128xf32>, vector<1x128xf32>, vector<1x128xf32>, vector<1x128xf32>, vector<1x128xf32>, vector<1x128xf32>, vector<1x128xf32> -> vector<8x128xf32>
    %c0_16 = arith.constant 0 : index
    %c0_17 = arith.constant 0 : index
    %41 = vector.load %arg4[%c0_16, %c0_17] : memref<8x128xf32, #tpu.memory_space<vmem>>, vector<8x128xf32>
    tpu.vector_store %arg4[%c0_16, %c0_17], %40 {strides = array<i32>} : memref<8x128xf32, #tpu.memory_space<vmem>>, vector<8x128xf32>,
    return
  }
}

</mosaic_0001>

<bundles_post_ra>
// kernel: tpu_custom_call.1
= control target key start
LH: loop header
LB: loop body
LE: loop exit
PB: predicated region body
PF: predicated region fallthrough
CT: control target
= control target key end

     0   :  { %9 = vsyncpa [#allocation3], 0  ;;  %s1889_s0 = inlined_call_operand.hbm [shape: f32[8,128], index: 0, kind: input, shape index: {}]   ;;  %s1890_s1 = inlined_call_operand.hbm [shape: f32[128,128], index: 1, kind: input, shape index: {}]   ;;  %s1891_s2 = inlined_call_operand.hbm [shape: f32[128,128], index: 2, kind: input, shape index: {}]   ;;  %s1892_s3 = inlined_call_operand.vmem [shape: f32[1,128], index: 3, kind: input, shape index: {}]   ;;  %s1893_s4 = inlined_call_operand.hbm [shape: f32[8,128], index: 4, kind: output, shape index: {}]  }
   0x1   :  { %10 = vsyncpa [#allocation6], 0 }
   0x2   :  { %11 = vsyncpa [#allocation4], 0  ;;  %s1617_s15 = smov [#allocation5]   ;;  %s1523_s19 = scalar_lea.hbm %s1890_s1, 2048 }
   0x3   :  { %s27_s16 = sshll.u32 %s1617_s15, 4  ;;  %p1524_p0 = scmp.ne.s32.totalorder %s1890_s1, %s1523_s19  ;;  %s28_s16 = int_to_ptr.vmem [resolvable:$true] %s27_s16 }
   0x4   :  { %p1527_p1 = scmp.lt.u32.totalorder %s1523_s19, %s1890_s1 }
   0x6   :  { %p1529_p2 = pnand %p1527_p1, %p1524_p0 }
   0x8   :  { %1532 = shalt.err (!%p1529_p2)
}
   0x9   :  { %s1533_s24 = scalar_lea.vmem %s28_s16, 2048  ;;  %p1538_p4 = scmp.lt.s32.totalorder %s28_s16, %s28_s16 }
   0xa   :  { %p1534_p3 = scmp.ne.s32.totalorder %s28_s16, %s1533_s24  ;;  %p1539_p5 = scmp.lt.s32.totalorder %s1533_s24, %s1533_s24 }
   0xc   :  { %p1540_p6 = por %p1539_p5, %p1538_p4 }
   0xe   :  { %p1541_p7 = pnand %p1540_p6, %p1534_p3 }
  0x10   :  { %1544 = shalt.err (!%p1541_p7)
}
  0x11   :  { %s1618_s25 = smov 128   ;;  %s1619_s26 = smov 8  }
  0x12   :  { %33 = dma.hbm_to_vmem [thread:$0]  %s1890_s1, 2048, %s28_s16, [#allocation6], %s1618_s25, %s1618_s25, %s1619_s26  }
  0x13   :  { %s1620_s29 = smov [#allocation2]   ;;  %s1621_s5 = smov [#allocation7]  }
  0x14   :  { %s18_s30 = sshll.u32 %s1620_s29, 4  ;;  %s39_s6 = sshll.u32 %s1621_s5, 4  ;;  %s19_s30 = int_to_ptr.vmem [resolvable:$true] %s18_s30  ;;  %s40_s6 = int_to_ptr.vmem [resolvable:$true] %s39_s6 }
  0x15   :  { %s1545_s9 = scalar_lea.hbm %s1889_s0, 128 }
  0x16   :  { %p1546_p8 = scmp.ne.s32.totalorder %s1889_s0, %s1545_s9  ;;  %p1549_p9 = scmp.lt.u32.totalorder %s1545_s9, %s1889_s0 }
  0x18   :  { %p1551_p10 = pnand %p1549_p9, %p1546_p8 }
  0x1a   :  { %1554 = shalt.err (!%p1551_p10)
}
  0x1b   :  { %s1555_s1 = scalar_lea.vmem %s19_s30, 128  ;;  %p1560_p12 = scmp.lt.s32.totalorder %s19_s30, %s19_s30 }
  0x1c   :  { %p1556_p11 = scmp.ne.s32.totalorder %s19_s30, %s1555_s1  ;;  %p1561_p13 = scmp.lt.s32.totalorder %s1555_s1, %s1555_s1 }
  0x1e   :  { %p1562_p0 = por %p1561_p13, %p1560_p12 }
  0x20   :  { %p1563_p1 = pnand %p1562_p0, %p1556_p11 }
  0x22   :  { %1566 = shalt.err (!%p1563_p1)
}
  0x23   :  { %21 = dma.hbm_to_vmem [thread:$0]  %s1889_s0, 128, %s19_s30, [#allocation3]  }
  0x24   :  { %s1567_s18 = scalar_lea.hbm %s1891_s2, 2048 }
  0x25   :  { %p1568_p2 = scmp.ne.s32.totalorder %s1891_s2, %s1567_s18  ;;  %p1571_p3 = scmp.lt.u32.totalorder %s1567_s18, %s1891_s2 }
  0x27   :  { %p1573_p4 = pnand %p1571_p3, %p1568_p2 }
  0x29   :  { %1576 = shalt.err (!%p1573_p4)
}
  0x2a   :  { %s1577_s23 = scalar_lea.vmem %s40_s6, 2048  ;;  %p1582_p6 = scmp.lt.s32.totalorder %s40_s6, %s40_s6 }
  0x2b   :  { %p1578_p5 = scmp.ne.s32.totalorder %s40_s6, %s1577_s23  ;;  %p1583_p7 = scmp.lt.s32.totalorder %s1577_s23, %s1577_s23 }
  0x2d   :  { %p1584_p8 = por %p1583_p7, %p1582_p6 }
  0x2f   :  { %p1585_p9 = pnand %p1584_p8, %p1578_p5 }
  0x31   :  { %1588 = shalt.err (!%p1585_p9)
}
  0x32   :  { %45 = dma.hbm_to_vmem [thread:$0]  %s1891_s2, 2048, %s40_s6, [#allocation6], %s1618_s25, %s1618_s25, %s1619_s26  }
  0x33   :  { %1611 = dma.done.wait [#allocation3], 128  }
  0x34   :  { %1612 = vsyncadd [#allocation3], 4294967168 }
  0x35   :  { %1613 = dma.done.wait [#allocation6], 4096  }
  0x36   :  { %1614 = vsyncadd [#allocation6], 4294963200  ;;  %v1622_v0 = vmov 0.0|0.0   ;;  %vm1623_vm0 = vmmov 0   ;;  %v1624_v1 = vmov 0.0   ;;  %v58_v2 = vld [vmem:[#allocation5] sm:$0xff] }
  0x37   :  { %1282 = vmatprep.subr.bf16.mxu0 %v1622_v0  ;;  %1306 = vmatprep.subr.bf16.mxu1 %v1622_v0  ;;  %v59_v3 = vld [vmem:[#allocation5 + $0x8] sm:$0xff]  ;;  %v151_v4 = vld [vmem:[#allocation7] sm:$0xff]  ;;  %v60_v7 = vld [vmem:[#allocation5 + $0x10] sm:$0xff]  ;;  %vm782_vm1 = vcmask 1040384   ;;  %vm784_vm2 = vcmask 1041408   ;;  %vm786_vm3 = vcmask 1042432  }
  0x38   :  { %999 = vmatprep.mubr.msk.f32.mxu0 %vm1623_vm0, %v1624_v1  ;;  %1034 = vmatprep.mubr.msk.f32.mxu1 %vm1623_vm0, %v1624_v1  ;;  %v1283_v5 = vpack.c.bf16 %v59_v3, %v58_v2  ;;  %v152_v6 = vld [vmem:[#allocation7 + $0x8] sm:$0xff]  ;;  %v61_v8 = vld [vmem:[#allocation5 + $0x18] sm:$0xff]  ;;  %v153_v10 = vld [vmem:[#allocation7 + $0x10] sm:$0xff]  ;;  %vm788_vm4 = vcmask 1043456   ;;  %vm790_vm5 = vcmask 1044480   ;;  %vm792_vm6 = vcmask 1045504  }
  0x39   :  { %v1699_v9 = vpack.c.bf16 %v152_v6, %v151_v4  ;;  %v154_v11 = vld [vmem:[#allocation7 + $0x18] sm:$0xff]  ;;  %v1286_v12 = vpack.c.bf16 %v61_v8, %v60_v7  ;;  %v62_v14 = vld [vmem:[#allocation5 + $0x20] sm:$0xff]  ;;  %v63_v15 = vld [vmem:[#allocation5 + $0x28] sm:$0xff]  ;;  %vm794_vm7 = vcmask 1046528  }
  0x3a   :  { %1284 = vmatpush3.bf16.msra.mxu0 %v1283_v5  ;;  %v1703_v13 = vpack.c.bf16 %v154_v11, %v153_v10  ;;  %v155_v16 = vld [vmem:[#allocation7 + $0x20] sm:$0xff]  ;;  %v156_v17 = vld [vmem:[#allocation7 + $0x28] sm:$0xff]  ;;  %v1289_v18 = vpack.c.bf16 %v63_v15, %v62_v14  ;;  %v64_v20 = vld [vmem:[#allocation5 + $0x30] sm:$0xff] }
  0x3b   :  { %1308 = vmatpush3.bf16.msra.mxu1 %v1699_v9  ;;  %1285 = vmatprep.subr.bf16.mxu0 %v1622_v0  ;;  %v1708_v19 = vpack.c.bf16 %v156_v17, %v155_v16  ;;  %v65_v21 = vld [vmem:[#allocation5 + $0x38] sm:$0xff]  ;;  %v157_v22 = vld [vmem:[#allocation7 + $0x30] sm:$0xff]  ;;  %v66_v26 = vld [vmem:[#allocation5 + $0x40] sm:$0xff] }
  0x3c   :  { %1309 = vmatprep.subr.bf16.mxu1 %v1622_v0  ;;  %v158_v23 = vld [vmem:[#allocation7 + $0x38] sm:$0xff]  ;;  %v1292_v24 = vpack.c.bf16 %v65_v21, %v64_v20  ;;  %v67_v27 = vld [vmem:[#allocation5 + $0x48] sm:$0xff]  ;;  %v159_v28 = vld [vmem:[#allocation7 + $0x40] sm:$0xff] }
  0x3d   :  { %v1713_v25 = vpack.c.bf16 %v158_v23, %v157_v22  ;;  %v160_v29 = vld [vmem:[#allocation7 + $0x48] sm:$0xff]  ;;  %v1295_v30 = vpack.c.bf16 %v67_v27, %v66_v26  ;;  %v68_v32 = vld [vmem:[#allocation5 + $0x50] sm:$0xff]  ;;  %v69_v33 = vld [vmem:[#allocation5 + $0x58] sm:$0xff] }
  0x3e   :  { %1287 = vmatpush3.bf16.msra.mxu0 %v1286_v12  ;;  %v1718_v31 = vpack.c.bf16 %v160_v29, %v159_v28  ;;  %v161_v34 = vld [vmem:[#allocation7 + $0x50] sm:$0xff]  ;;  %v162_v35 = vld [vmem:[#allocation7 + $0x58] sm:$0xff]  ;;  %v1298_v36 = vpack.c.bf16 %v69_v33, %v68_v32  ;;  %v70_v38 = vld [vmem:[#allocation5 + $0x60] sm:$0xff] }
  0x3f   :  { %1311 = vmatpush3.bf16.msra.mxu1 %v1703_v13  ;;  %1288 = vmatprep.subr.bf16.mxu0 %v1622_v0  ;;  %v1723_v37 = vpack.c.bf16 %v162_v35, %v161_v34  ;;  %v71_v39 = vld [vmem:[#allocation5 + $0x68] sm:$0xff]  ;;  %v163_v40 = vld [vmem:[#allocation7 + $0x60] sm:$0xff]  ;;  %v72_v44 = vld [vmem:[#allocation5 + $0x70] sm:$0xff] }
  0x40   :  { %1312 = vmatprep.subr.bf16.mxu1 %v1622_v0  ;;  %v164_v41 = vld [vmem:[#allocation7 + $0x68] sm:$0xff]  ;;  %v1301_v42 = vpack.c.bf16 %v71_v39, %v70_v38  ;;  %v73_v45 = vld [vmem:[#allocation5 + $0x78] sm:$0xff]  ;;  %v165_v46 = vld [vmem:[#allocation7 + $0x70] sm:$0xff] }
  0x41   :  { %v1728_v43 = vpack.c.bf16 %v164_v41, %v163_v40  ;;  %v166_v47 = vld [vmem:[#allocation7 + $0x78] sm:$0xff]  ;;  %v1304_v48 = vpack.c.bf16 %v73_v45, %v72_v44 }
  0x42   :  { %1290 = vmatpush3.bf16.msra.mxu0 %v1289_v18  ;;  %v1733_v49 = vpack.c.bf16 %v166_v47, %v165_v46  ;;  %v57_v50 = vld [vmem:[#allocation2] sm:$0xff] }
  0x43   :  { %1314 = vmatpush3.bf16.msra.mxu1 %v1708_v19  ;;  %1291 = vmatprep.subr.bf16.mxu0 %v1622_v0  ;;  %v813_v51 = vld [vmem:[%s1892_s3] ss:$0 sm:$0xff]  ;;  %s1625_s3 = smov [#allocation8]  }
  0x44   :  { %1315 = vmatprep.subr.bf16.mxu1 %v1622_v0  ;;  %s803_s26 = sshll.u32 %s1625_s3, 4  ;;  %s804_s26 = int_to_ptr.vmem [resolvable:$true] %s803_s26 }
  0x45   :  { %s1589_s27 = scalar_lea.vmem %s804_s26, 128  ;;  %p1594_p11 = scmp.lt.s32.totalorder %s804_s26, %s804_s26 }
  0x46   :  { %1293 = vmatpush3.bf16.msra.mxu0 %v1292_v24  ;;  %p1590_p10 = scmp.ne.s32.totalorder %s804_s26, %s1589_s27  ;;  %p1595_p12 = scmp.lt.s32.totalorder %s1589_s27, %s1589_s27 }
  0x47   :  { %1317 = vmatpush3.bf16.msra.mxu1 %v1713_v25  ;;  %1294 = vmatprep.subr.bf16.mxu0 %v1622_v0 }
  0x48   :  { %1318 = vmatprep.subr.bf16.mxu1 %v1622_v0  ;;  %p1596_p13 = por %p1595_p12, %p1594_p11 }
  0x4a   :  { %1296 = vmatpush3.bf16.msra.mxu0 %v1295_v30  ;;  %p1597_p0 = pnand %p1596_p13, %p1590_p10 }
  0x4b   :  { %1320 = vmatpush3.bf16.msra.mxu1 %v1718_v31  ;;  %1297 = vmatprep.subr.bf16.mxu0 %v1622_v0 }
  0x4c   :  { %1321 = vmatprep.subr.bf16.mxu1 %v1622_v0 }
  0x4e   :  { %1299 = vmatpush3.bf16.msra.mxu0 %v1298_v36 }
  0x4f   :  { %1323 = vmatpush3.bf16.msra.mxu1 %v1723_v37  ;;  %1300 = vmatprep.subr.bf16.mxu0 %v1622_v0 }
  0x50   :  { %1324 = vmatprep.subr.bf16.mxu1 %v1622_v0 }
  0x52   :  { %1302 = vmatpush3.bf16.msra.mxu0 %v1301_v42 }
  0x53   :  { %1326 = vmatpush3.bf16.msra.mxu1 %v1728_v43  ;;  %1303 = vmatprep.subr.bf16.mxu0 %v1622_v0 }
  0x54   :  { %1327 = vmatprep.subr.bf16.mxu1 %v1622_v0 }
  0x56   :  { %1305 = vmatpush3.bf16.msra.mxu0 %v1304_v48 }
  0x57   :  { %1329 = vmatpush3.bf16.msra.mxu1 %v1733_v49  ;;  %1330 = vmatprep.subr.bf16.mxu0 %v1622_v0 }
  0x58   :  { %1354 = vmatprep.subr.bf16.mxu1 %v1622_v0 }
  0x59   :  { %1000 = vmatmul.mubr.f32.vlgmr.msra.gmra.mrb[0].mxu0 %v57_v50 }
  0x5a   :  { %1035 = vmatmul.mubr.f32.vlgmr.msra.gmra.mrb[0].mxu1 %v1624_v1  ;;  %1332 = vmatpush3.bf16.msra.mxu0 %v1699_v9 }
  0x5b   :  { %1333 = vmatprep.subr.bf16.mxu0 %v1622_v0  ;;  %1069 = vmatprep.mubr.msk.f32.mxu0 %vm1623_vm0, %v1624_v1 }
  0x5c   :  { %1356 = vmatpush3.bf16.msra.mxu1 %v1699_v9  ;;  %1104 = vmatprep.mubr.msk.f32.mxu1 %vm1623_vm0, %v1624_v1 }
  0x5d   :  { %1357 = vmatprep.subr.bf16.mxu1 %v1622_v0 }
  0x5e   :  { %1335 = vmatpush3.bf16.msra.mxu0 %v1703_v13 }
  0x5f   :  { %1336 = vmatprep.subr.bf16.mxu0 %v1622_v0 }
  0x60   :  { %1359 = vmatpush3.bf16.msra.mxu1 %v1703_v13 }
  0x61   :  { %1360 = vmatprep.subr.bf16.mxu1 %v1622_v0 }
  0x62   :  { %1338 = vmatpush3.bf16.msra.mxu0 %v1708_v19 }
  0x63   :  { %1339 = vmatprep.subr.bf16.mxu0 %v1622_v0 }
  0x64   :  { %1362 = vmatpush3.bf16.msra.mxu1 %v1708_v19 }
  0x65   :  { %1363 = vmatprep.subr.bf16.mxu1 %v1622_v0 }
  0x66   :  { %1341 = vmatpush3.bf16.msra.mxu0 %v1713_v25 }
  0x67   :  { %1342 = vmatprep.subr.bf16.mxu0 %v1622_v0 }
  0x68   :  { %1365 = vmatpush3.bf16.msra.mxu1 %v1713_v25 }
  0x69   :  { %1366 = vmatprep.subr.bf16.mxu1 %v1622_v0 }
  0x6a   :  { %1344 = vmatpush3.bf16.msra.mxu0 %v1718_v31 }
  0x6b   :  { %1345 = vmatprep.subr.bf16.mxu0 %v1622_v0 }
  0x6c   :  { %1368 = vmatpush3.bf16.msra.mxu1 %v1718_v31 }
  0x6d   :  { %1369 = vmatprep.subr.bf16.mxu1 %v1622_v0 }
  0x6e   :  { %1347 = vmatpush3.bf16.msra.mxu0 %v1723_v37 }
  0x6f   :  { %1348 = vmatprep.subr.bf16.mxu0 %v1622_v0 }
  0x70   :  { %1371 = vmatpush3.bf16.msra.mxu1 %v1723_v37 }
  0x71   :  { %1372 = vmatprep.subr.bf16.mxu1 %v1622_v0 }
  0x72   :  { %1350 = vmatpush3.bf16.msra.mxu0 %v1728_v43 }
  0x73   :  { %1351 = vmatprep.subr.bf16.mxu0 %v1622_v0 }
  0x74   :  { %1374 = vmatpush3.bf16.msra.mxu1 %v1728_v43 }
  0x75   :  { %1375 = vmatprep.subr.bf16.mxu1 %v1622_v0 }
  0x76   :  { %1353 = vmatpush3.bf16.msra.mxu0 %v1733_v49 }
  0x77   :  { %1378 = vmatprep.subr.bf16.mxu0 %v1622_v0 }
  0x78   :  { %1377 = vmatpush3.bf16.msra.mxu1 %v1733_v49 }
  0x79   :  { %1402 = vmatprep.subr.bf16.mxu1 %v1622_v0 }
 0x12c   :  { %v147_v52 = vpop.f32.mrb[0].mxu0 }
 0x12d   :  { %v1779_v53 = vadd.f32 %v813_v51, %v147_v52  ;;  %v1001_v54 = vpop.f32.mrb[1].mxu0  ;;  %v233_v55 = vpop.f32.mrb[0].mxu1 }
 0x12e   :  { %v1036_v56 = vpop.f32.mrb[1].mxu1 }
 0x12f   :  { %v237_v57 = vadd.f32 %v233_v55, %v1779_v53 }
 0x131   :  { %1507 = vtanh.f32 %v237_v57 }
 0x13b   :  { %v1508_v58 = vpop.eup %1507 }
 0x13c   :  { %1070 = vmatmul.mubr.f32.vlgmr.msra.gmra.mrb[2].mxu0 %v1508_v58 }
 0x13d   :  { %1380 = vmatpush3.bf16.msra.mxu0 %v1699_v9  ;;  %1139 = vmatprep.mubr.msk.f32.mxu0 %vm1623_vm0, %v1624_v1 }
 0x13e   :  { %1381 = vmatprep.subr.bf16.mxu0 %v1622_v0 }
 0x141   :  { %1383 = vmatpush3.bf16.msra.mxu0 %v1703_v13 }
 0x142   :  { %1384 = vmatprep.subr.bf16.mxu0 %v1622_v0 }
 0x145   :  { %1386 = vmatpush3.bf16.msra.mxu0 %v1708_v19 }
 0x146   :  { %1387 = vmatprep.subr.bf16.mxu0 %v1622_v0 }
 0x149   :  { %1389 = vmatpush3.bf16.msra.mxu0 %v1713_v25 }
 0x14a   :  { %1390 = vmatprep.subr.bf16.mxu0 %v1622_v0 }
 0x14d   :  { %1392 = vmatpush3.bf16.msra.mxu0 %v1718_v31 }
 0x14e   :  { %1393 = vmatprep.subr.bf16.mxu0 %v1622_v0 }
 0x151   :  { %1395 = vmatpush3.bf16.msra.mxu0 %v1723_v37 }
 0x152   :  { %1396 = vmatprep.subr.bf16.mxu0 %v1622_v0 }
 0x155   :  { %1398 = vmatpush3.bf16.msra.mxu0 %v1728_v43 }
 0x156   :  { %1399 = vmatprep.subr.bf16.mxu0 %v1622_v0 }
 0x159   :  { %1401 = vmatpush3.bf16.msra.mxu0 %v1733_v49 }
 0x15a   :  { %1426 = vmatprep.subr.bf16.mxu0 %v1622_v0 }
 0x20f   :  { %v305_v59 = vpop.f32.mrb[2].mxu0 }
 0x210   :  { %v310_v60 = vrot.slane %v305_v59, 7  ;;  %v1071_v61 = vpop.f32.mrb[3].mxu0 }
 0x212   :  { %v312_v62 = vadd.f32 %v310_v60, %v1779_v53 }
 0x214   :  { %1509 = vtanh.f32 %v312_v62 }
 0x21e   :  { %v1510_v63 = vpop.eup %1509 }
 0x21f   :  { %v315_v2 = vrot.slane %v1510_v63, 1  ;;  %v783_v8 = vsel %vm782_vm1, %v1508_v58, %v1510_v63 }
 0x221   :  { %1105 = vmatmul.mubr.f32.vlgmr.msra.gmra.mrb[2].mxu1 %v315_v2 }
 0x222   :  { %1404 = vmatpush3.bf16.msra.mxu1 %v1699_v9  ;;  %1174 = vmatprep.mubr.msk.f32.mxu1 %vm1623_vm0, %v1624_v1 }
 0x223   :  { %1405 = vmatprep.subr.bf16.mxu1 %v1622_v0 }
 0x226   :  { %1407 = vmatpush3.bf16.msra.mxu1 %v1703_v13 }
 0x227   :  { %1408 = vmatprep.subr.bf16.mxu1 %v1622_v0 }
 0x22a   :  { %1410 = vmatpush3.bf16.msra.mxu1 %v1708_v19 }
 0x22b   :  { %1411 = vmatprep.subr.bf16.mxu1 %v1622_v0 }
 0x22e   :  { %1413 = vmatpush3.bf16.msra.mxu1 %v1713_v25 }
 0x22f   :  { %1414 = vmatprep.subr.bf16.mxu1 %v1622_v0 }
 0x232   :  { %1416 = vmatpush3.bf16.msra.mxu1 %v1718_v31 }
 0x233   :  { %1417 = vmatprep.subr.bf16.mxu1 %v1622_v0 }
 0x236   :  { %1419 = vmatpush3.bf16.msra.mxu1 %v1723_v37 }
 0x237   :  { %1420 = vmatprep.subr.bf16.mxu1 %v1622_v0 }
 0x23a   :  { %1422 = vmatpush3.bf16.msra.mxu1 %v1728_v43 }
 0x23b   :  { %1423 = vmatprep.subr.bf16.mxu1 %v1622_v0 }
 0x23e   :  { %1425 = vmatpush3.bf16.msra.mxu1 %v1733_v49 }
 0x23f   :  { %1450 = vmatprep.subr.bf16.mxu1 %v1622_v0 }
 0x2f4   :  { %v383_v3 = vpop.f32.mrb[2].mxu1 }
 0x2f5   :  { %v388_v4 = vrot.slane %v383_v3, 6  ;;  %v1106_v5 = vpop.f32.mrb[3].mxu1 }
 0x2f7   :  { %v390_v6 = vadd.f32 %v388_v4, %v1779_v53 }
 0x2f9   :  { %1511 = vtanh.f32 %v390_v6 }
 0x303   :  { %v1512_v7 = vpop.eup %1511 }
 0x304   :  { %v393_v10 = vrot.slane %v1512_v7, 2  ;;  %v785_v11 = vsel %vm784_vm2, %v783_v8, %v1512_v7 }
 0x306   :  { %1140 = vmatmul.mubr.f32.vlgmr.msra.gmra.mrb[4].mxu0 %v393_v10 }
 0x307   :  { %1428 = vmatpush3.bf16.msra.mxu0 %v1699_v9  ;;  %1209 = vmatprep.mubr.msk.f32.mxu0 %vm1623_vm0, %v1624_v1 }
 0x308   :  { %1429 = vmatprep.subr.bf16.mxu0 %v1622_v0 }
 0x30b   :  { %1431 = vmatpush3.bf16.msra.mxu0 %v1703_v13 }
 0x30c   :  { %1432 = vmatprep.subr.bf16.mxu0 %v1622_v0 }
 0x30f   :  { %1434 = vmatpush3.bf16.msra.mxu0 %v1708_v19 }
 0x310   :  { %1435 = vmatprep.subr.bf16.mxu0 %v1622_v0 }
 0x313   :  { %1437 = vmatpush3.bf16.msra.mxu0 %v1713_v25 }
 0x314   :  { %1438 = vmatprep.subr.bf16.mxu0 %v1622_v0 }
 0x317   :  { %1440 = vmatpush3.bf16.msra.mxu0 %v1718_v31 }
 0x318   :  { %1441 = vmatprep.subr.bf16.mxu0 %v1622_v0 }
 0x31b   :  { %1443 = vmatpush3.bf16.msra.mxu0 %v1723_v37 }
 0x31c   :  { %1444 = vmatprep.subr.bf16.mxu0 %v1622_v0 }
 0x31f   :  { %1446 = vmatpush3.bf16.msra.mxu0 %v1728_v43 }
 0x320   :  { %1447 = vmatprep.subr.bf16.mxu0 %v1622_v0 }
 0x323   :  { %1449 = vmatpush3.bf16.msra.mxu0 %v1733_v49 }
 0x324   :  { %1474 = vmatprep.subr.bf16.mxu0 %v1622_v0 }
 0x3d9   :  { %v461_v12 = vpop.f32.mrb[4].mxu0 }
 0x3da   :  { %v466_v14 = vrot.slane %v461_v12, 5  ;;  %v1141_v15 = vpop.f32.mrb[5].mxu0 }
 0x3dc   :  { %v468_v16 = vadd.f32 %v466_v14, %v1779_v53 }
 0x3de   :  { %1513 = vtanh.f32 %v468_v16 }
 0x3e8   :  { %v1514_v17 = vpop.eup %1513 }
 0x3e9   :  { %v471_v18 = vrot.slane %v1514_v17, 3  ;;  %v787_v20 = vsel %vm786_vm3, %v785_v11, %v1514_v17 }
 0x3eb   :  { %1175 = vmatmul.mubr.f32.vlgmr.msra.gmra.mrb[4].mxu1 %v471_v18 }
 0x3ec   :  { %1452 = vmatpush3.bf16.msra.mxu1 %v1699_v9  ;;  %1244 = vmatprep.mubr.msk.f32.mxu1 %vm1623_vm0, %v1624_v1 }
 0x3ed   :  { %1453 = vmatprep.subr.bf16.mxu1 %v1622_v0 }
 0x3f0   :  { %1455 = vmatpush3.bf16.msra.mxu1 %v1703_v13 }
 0x3f1   :  { %1456 = vmatprep.subr.bf16.mxu1 %v1622_v0 }
 0x3f4   :  { %1458 = vmatpush3.bf16.msra.mxu1 %v1708_v19 }
 0x3f5   :  { %1459 = vmatprep.subr.bf16.mxu1 %v1622_v0 }
 0x3f8   :  { %1461 = vmatpush3.bf16.msra.mxu1 %v1713_v25 }
 0x3f9   :  { %1462 = vmatprep.subr.bf16.mxu1 %v1622_v0 }
 0x3fc   :  { %1464 = vmatpush3.bf16.msra.mxu1 %v1718_v31 }
 0x3fd   :  { %1465 = vmatprep.subr.bf16.mxu1 %v1622_v0 }
 0x400   :  { %1467 = vmatpush3.bf16.msra.mxu1 %v1723_v37 }
 0x401   :  { %1468 = vmatprep.subr.bf16.mxu1 %v1622_v0 }
 0x404   :  { %1470 = vmatpush3.bf16.msra.mxu1 %v1728_v43 }
 0x405   :  { %1471 = vmatprep.subr.bf16.mxu1 %v1622_v0 }
 0x408   :  { %1473 = vmatpush3.bf16.msra.mxu1 %v1733_v49 }
 0x4be   :  { %v539_v21 = vpop.f32.mrb[4].mxu1 }
 0x4bf   :  { %v544_v22 = vrot.slane %v539_v21, 4  ;;  %v1176_v23 = vpop.f32.mrb[5].mxu1 }
 0x4c1   :  { %v546_v24 = vadd.f32 %v544_v22, %v1779_v53 }
 0x4c3   :  { %1515 = vtanh.f32 %v546_v24 }
 0x4cd   :  { %v1516_v26 = vpop.eup %1515 }
 0x4ce   :  { %v549_v27 = vrot.slane %v1516_v26, 4  ;;  %v789_v28 = vsel %vm788_vm4, %v787_v20, %v1516_v26 }
 0x4d0   :  { %1210 = vmatmul.mubr.f32.vlgmr.msra.gmra.mrb[6].mxu0 %v549_v27 }
 0x4d1   :  { %1476 = vmatpush3.bf16.msra.mxu0 %v1699_v9  ;;  %1279 = vmatprep.mubr.msk.f32.mxu0 %vm1623_vm0, %v1624_v1 }
 0x4d2   :  { %1477 = vmatprep.subr.bf16.mxu0 %v1622_v0 }
 0x4d5   :  { %1479 = vmatpush3.bf16.msra.mxu0 %v1703_v13 }
 0x4d6   :  { %1480 = vmatprep.subr.bf16.mxu0 %v1622_v0 }
 0x4d9   :  { %1482 = vmatpush3.bf16.msra.mxu0 %v1708_v19 }
 0x4da   :  { %1483 = vmatprep.subr.bf16.mxu0 %v1622_v0 }
 0x4dd   :  { %1485 = vmatpush3.bf16.msra.mxu0 %v1713_v25 }
 0x4de   :  { %1486 = vmatprep.subr.bf16.mxu0 %v1622_v0 }
 0x4e1   :  { %1488 = vmatpush3.bf16.msra.mxu0 %v1718_v31 }
 0x4e2   :  { %1489 = vmatprep.subr.bf16.mxu0 %v1622_v0 }
 0x4e5   :  { %1491 = vmatpush3.bf16.msra.mxu0 %v1723_v37 }
 0x4e6   :  { %1492 = vmatprep.subr.bf16.mxu0 %v1622_v0 }
 0x4e9   :  { %1494 = vmatpush3.bf16.msra.mxu0 %v1728_v43 }
 0x4ea   :  { %1495 = vmatprep.subr.bf16.mxu0 %v1622_v0 }
 0x4ed   :  { %1497 = vmatpush3.bf16.msra.mxu0 %v1733_v49 }
 0x5a3   :  { %v617_v1 = vpop.f32.mrb[6].mxu0 }
 0x5a4   :  { %v622_v9 = vrot.slane %v617_v1, 3  ;;  %v1211_v13 = vpop.f32.mrb[7].mxu0 }
 0x5a6   :  { %v624_v19 = vadd.f32 %v622_v9, %v1779_v53 }
 0x5a8   :  { %1517 = vtanh.f32 %v624_v19 }
 0x5b2   :  { %v1518_v25 = vpop.eup %1517 }
 0x5b3   :  { %v627_v29 = vrot.slane %v1518_v25, 5  ;;  %v791_v30 = vsel %vm790_vm5, %v789_v28, %v1518_v25 }
 0x5b5   :  { %1245 = vmatmul.mubr.f32.vlgmr.msra.gmra.mrb[6].mxu1 %v627_v29 }
 0x688   :  { %v695_v31 = vpop.f32.mrb[6].mxu1 }
 0x689   :  { %v700_v32 = vrot.slane %v695_v31, 2  ;;  %v1246_v33 = vpop.f32.mrb[7].mxu1 }
 0x68b   :  { %v702_v34 = vadd.f32 %v700_v32, %v1779_v53 }
 0x68d   :  { %1519 = vtanh.f32 %v702_v34 }
 0x697   :  { %v1520_v0 = vpop.eup %1519 }
 0x698   :  { %v705_v35 = vrot.slane %v1520_v0, 6  ;;  %v793_v36 = vsel %vm792_vm6, %v791_v30, %v1520_v0 }
 0x69a   :  { %1280 = vmatmul.mubr.f32.vlgmr.msra.gmra.mrb[8].mxu0 %v705_v35 }
 0x76d   :  { %v773_v37 = vpop.f32.mrb[8].mxu0 }
 0x76e   :  { %v778_v38 = vrot.slane %v773_v37, 1  ;;  %v1281_v39 = vpop.f32.mrb[9].mxu0 }
 0x770   :  { %v780_v40 = vadd.f32 %v778_v38, %v1779_v53 }
 0x772   :  { %1521 = vtanh.f32 %v780_v40 }
 0x77c   :  { %v1522_v41 = vpop.eup %1521 }
 0x77d   :  { %v795_v42 = vsel %vm794_vm7, %v793_v36, %v1522_v41 }
 0x77e   :  { %796 = vst [vmem:[#allocation8] sm:$0xff] %v795_v42 }
 0x77f   :  { %1600 = shalt.err (!%p1597_p0)
}
 0x780   :  { %s1601_s30 = scalar_lea.hbm %s1893_s4, 128 }
 0x781   :  { %p1602_p1 = scmp.ne.s32.totalorder %s1893_s4, %s1601_s30  ;;  %p1605_p2 = scmp.lt.u32.totalorder %s1601_s30, %s1893_s4 }
 0x783   :  { %p1607_p3 = pnand %p1605_p2, %p1602_p1 }
 0x785   :  { %1610 = shalt.err (!%p1607_p3)
}
 0x786   :  { %806 = dma.vmem_to_hbm [thread:$0]  %s804_s26, 128, %s1893_s4, [#allocation4]  }
 0x787   :  { %1615 = dma.done.wait [#allocation4], 128  }
 0x788   :  { %1616 = vsyncadd [#allocation4], 4294967168 }
 0x789   :  { %810 = vsyncpa [#allocation3], 1 }
 0x78a   :  { %811 = vsyncpa [#allocation6], 1 }
 0x78b   :  { %812 = vsyncpa [#allocation4], 1 }

</bundles_post_ra>
